<compile_context>
chip_gen: v5e
topology: v5e:2x2
jax: 0.10.0
libtpu: 0.0.40
codegen_flags: <defaults>
</compile_context>

<pallas_src>
import functools

import jax
import jax.numpy as jnp
from jax import lax
from jax.experimental import pallas as pl
from jax.experimental.pallas import tpu as pltpu


def _focal_loss_kernel(logits_ref, targets_ref, out_ref, acc_ref, *,
                       alpha, gamma, scale, n_total, tile, blocks_per_core,
                       class_axis):
    """One (core_split p, sample_block j) grid step.

    class_axis == 0: logits block is (C, TILE_N) -- samples lane-dense.
    class_axis == 1: logits block is (TILE_N, C) -- classes on lanes.
    """
    j = pl.program_id(1)
    sample_axis = 1 - class_axis

    # Zero this core's resident accumulator at the start of its sample loop.
    @pl.when(j == 0)
    def _():
        acc_ref[...] = jnp.zeros_like(acc_ref)

    x = logits_ref[...].astype(jnp.float32)
    t = targets_ref[...]                                   # int32 class ids

    # Numerically stable log-sum-exp pieces.
    m = jnp.max(x, axis=class_axis, keepdims=True)
    e = jnp.exp(x - m)
    s = jnp.sum(e, axis=class_axis, keepdims=True)

    # logits[target] via a masked reduce. The iota is narrow (1,C)/(C,1) and
    # broadcasting against t does the compare (no full-tile iota per step).
    # NOTE: out-of-range targets silently give x_t = 0 (finite but wrong);
    # inputs are assumed pre-validated (PyTorch would raise).
    iota_shape = (1, x.shape[1]) if class_axis == 1 else (x.shape[0], 1)
    cls = lax.broadcasted_iota(jnp.int32, iota_shape, class_axis)
    x_t = jnp.sum(jnp.where(cls == t, x, 0.0), axis=class_axis, keepdims=True)

    z = x_t - m
    ce = jnp.log(s) - z                                    # = logsumexp(x) - x_t
    pt = jnp.exp(-ce)                                      # torch: pt = exp(-BCE); no divide

    # (1 - pt)**gamma, clamped so fp noise (pt slightly > 1) cannot give NaN.
    one_minus_pt = jnp.maximum(1.0 - pt, 0.0)
    if gamma == 0.0:
        mod = jnp.ones_like(one_minus_pt)
    elif gamma == 1.0:
        mod = one_minus_pt
    elif gamma == 2.0:
        mod = one_minus_pt * one_minus_pt                   # single VPU mul, no pow
    else:
        mod = jnp.exp(gamma * jnp.log(jnp.maximum(one_minus_pt, 1e-38)))
        mod = jnp.where(one_minus_pt > 0.0, mod, 0.0)

    focal = alpha * mod * ce                                # per-sample vector

    # Mask by GLOBAL sample index, using the UNCLAMPED block id, so both the
    # padded remainder block and fully-out-of-range blocks (from the core
    # split) contribute exactly zero. Keep all ops above strictly per-sample.
    bi = pl.program_id(0) * blocks_per_core + j
    sample = lax.broadcasted_iota(jnp.int32, focal.shape, sample_axis) + bi * tile
    focal = jnp.where(sample < n_total, focal, 0.0)

    # Per-sample vector accumulator: plain VPU add per step; the cross-lane
    # collapse happens exactly once below.
    acc_ref[...] += focal

    @pl.when(j == pl.num_programs(1) - 1)
    def _():
        total = jnp.sum(acc_ref[...]) * scale               # this core's partial
        out_ref[...] = total + jnp.zeros_like(out_ref)       # lane-dense (1, 128)


def _vmem_budget():
    """(per-buffer tile byte target, scoped vmem limit), generation-aware."""
    try:
        cap = pltpu.get_tpu_info().vmem_capacity_bytes
    except Exception:
        # Not queryable: be conservative (safe even on v7x's 64 MiB VMEM).
        return 8 << 20, 32 << 20
    if cap <= (64 << 20):           # v7x-class: 64 MiB / TensorCore -> headroom
        return 8 << 20, 40 << 20
    return 16 << 20, 64 << 20       # v5e / v6e: 128 MiB physical VMEM


def _choose_tile(n, c, itemsize, target_bytes, lane_major, requested=None):
    """Sample-axis tile sized by bytes (no fixed row cap), rounded to the
    layout quantum: 128 lanes (class-major) or the dtype sublane multiple."""
    quantum = 128 if lane_major else max(8, 32 // max(1, itemsize))
    if requested is not None:
        t = max(quantum, (requested // quantum) * quantum)
    else:
        t = max(quantum, (target_bytes // max(1, c * itemsize)) // quantum * quantum)
    return n if t >= n else t


def focal_loss(logits, targets, alpha=1.0, gamma=2.0, reduction='mean',
               tile_samples=None, class_major=None, num_core_splits=None):
    """logits: (N, C) float, targets: (N,) int class indices -> scalar loss.

    alpha is a scalar, matching the PyTorch module (no per-class alpha).
    """
    n, c = logits.shape
    itemsize = jnp.dtype(logits.dtype).itemsize
    target_bytes, vmem_limit = _vmem_budget()

    if reduction == 'mean':
        scale = 1.0 / n
    elif reduction == 'sum':
        scale = 1.0
    else:
        # TODO(synk): reduction='none' (per-sample vector output) not implemented.
        raise NotImplementedError("only 'mean' and 'sum' reductions are fused")

    # Lane-dense layout for small class counts.
    if class_major is None:
        class_major = c < 128

    tile = _choose_tile(n, c, itemsize, target_bytes, class_major, tile_samples)

    if 2 * tile * c * itemsize > vmem_limit:
        # TODO(synk): inner C-axis grid with online logsumexp for vocab-scale C.
        raise NotImplementedError(
            "a double-buffered (tile, C) block exceeds the VMEM budget; "
            "needs the inner class-axis grid")

    nb = pl.cdiv(n, tile)                        # number of sample blocks
    if num_core_splits is None:
        num_core_splits = 2 if nb >= 2 else 1    # v7x: one partial per TensorCore
    p_split = num_core_splits
    bpc = pl.cdiv(nb, p_split)                   # sample blocks per core split

    if class_major:
        x2 = logits.T                                      # (C, N): samples on lanes
        t2 = targets.astype(jnp.int32).reshape(1, n)
        logits_spec = pl.BlockSpec(
            (c, tile), lambda p, j: (0, jnp.minimum(p * bpc + j, nb - 1)))
        targets_spec = pl.BlockSpec(
            (1, tile), lambda p, j: (0, jnp.minimum(p * bpc + j, nb - 1)))
        acc_shape = (1, tile)
        class_axis = 0
    else:
        x2 = logits                                        # (N, C): classes on lanes
        t2 = targets.astype(jnp.int32).reshape(n, 1)
        logits_spec = pl.BlockSpec(
            (tile, c), lambda p, j: (jnp.minimum(p * bpc + j, nb - 1), 0))
        targets_spec = pl.BlockSpec(
            (tile, 1), lambda p, j: (jnp.minimum(p * bpc + j, nb - 1), 0))
        acc_shape = (tile, 1)
        class_axis = 1

    kernel = functools.partial(
        _focal_loss_kernel, alpha=float(alpha), gamma=float(gamma),
        scale=float(scale), n_total=n, tile=tile, blocks_per_core=bpc,
        class_axis=class_axis)

    out = pl.pallas_call(
        kernel,
        out_shape=jax.ShapeDtypeStruct((1, 128 * p_split), jnp.float32),
        grid_spec=pltpu.PrefetchScalarGridSpec(
            num_scalar_prefetch=0,
            grid=(p_split, bpc),
            in_specs=[logits_spec, targets_spec],
            out_specs=pl.BlockSpec((1, 128), lambda p, j: (0, p)),
            scratch_shapes=[pltpu.VMEM(acc_shape, jnp.float32)]),
        compiler_params=pltpu.CompilerParams(
            dimension_semantics=("parallel", "arbitrary"),
            vmem_limit_bytes=vmem_limit),
    )(x2, t2)

    # Sum per-core partials (each partial is replicated across its 128 lanes).
    return jnp.sum(out.reshape(p_split, 128)[:, 0])


def focal_loss_ref(logits, targets, alpha=1.0, gamma=2.0, reduction='mean'):
    """Pure-JAX reference matching the torch module."""
    x = logits.astype(jnp.float32)
    lse = jax.scipy.special.logsumexp(x, axis=-1)
    x_t = jnp.take_along_axis(x, targets[:, None], axis=-1)[:, 0]
    ce = lse - x_t
    pt = jnp.exp(-ce)
    f = alpha * (1.0 - pt) ** gamma * ce
    return jnp.mean(f) if reduction == 'mean' else jnp.sum(f)


if __name__ == "__main__":
    key = jax.random.PRNGKey(0)
    k1, k2, k3, k4, k5, k6 = jax.random.split(key, 6)

    # 1) Small classification batch (class-major lane-dense path, single block).
    N, C = 8, 16
    logits = jax.random.normal(k1, (N, C), dtype=jnp.float32)
    targets = jax.random.randint(k2, (N,), 0, C, dtype=jnp.int32)
    loss = focal_loss(logits, targets, alpha=1.0, gamma=2.0)
    jax.block_until_ready(loss)
    ref = focal_loss_ref(logits, targets, 1.0, 2.0, 'mean')
    assert jnp.allclose(loss, ref, rtol=1e-4, atol=1e-5), (loss, ref)

    # 1b) Sum reduction + gamma=1 branch on the same data.
    loss_s = focal_loss(logits, targets, alpha=0.25, gamma=1.0, reduction='sum')
    jax.block_until_ready(loss_s)
    ref_s = focal_loss_ref(logits, targets, 0.25, 1.0, 'sum')
    assert jnp.allclose(loss_s, ref_s, rtol=1e-4, atol=1e-5), (loss_s, ref_s)

    # 2) Multi-block class-major path: remainder masking + dual-core split +
    #    clamped overhang block.
    N2, C2 = 300, 16
    logits2 = jax.random.normal(k3, (N2, C2), dtype=jnp.float32)
    targets2 = jax.random.randint(k4, (N2,), 0, C2, dtype=jnp.int32)
    loss2 = focal_loss(logits2, targets2, alpha=0.5, gamma=2.0, tile_samples=128)
    jax.block_until_ready(loss2)
    ref2 = focal_loss_ref(logits2, targets2, 0.5, 2.0, 'mean')
    assert jnp.allclose(loss2, ref2, rtol=1e-4, atol=1e-5), (loss2, ref2)

    # 3) Row-major (classes-on-lanes) path for C >= 128, multi-block, P=2.
    N3, C3 = 40, 256
    logits3 = jax.random.normal(k5, (N3, C3), dtype=jnp.float32)
    targets3 = jax.random.randint(k6, (N3,), 0, C3, dtype=jnp.int32)
    loss3 = focal_loss(logits3, targets3, alpha=1.0, gamma=2.0, tile_samples=8)
    jax.block_until_ready(loss3)
    ref3 = focal_loss_ref(logits3, targets3, 1.0, 2.0, 'mean')
    assert jnp.allclose(loss3, ref3, rtol=1e-4, atol=1e-5), (loss3, ref3)

    print("KERNEL_OK")
</pallas_src>

<mosaic_0001>
module attributes {stable_mosaic.version = 11 : i64} {
  func.func @_focal_loss_kernel(%arg0: i32, %arg1: i32, %arg2: memref<16x8xf32, #tpu.memory_space<vmem>>, %arg3: memref<1x8xi32, #tpu.memory_space<vmem>>, %arg4: memref<1x128xf32, #tpu.memory_space<vmem>>, %arg5: memref<1x8xf32, #tpu.memory_space<vmem>>) attributes {dimension_semantics = [#tpu.dimension_semantics<parallel>, #tpu.dimension_semantics<arbitrary>], iteration_bounds = array<i64: 1, 1>, scalar_prefetch = 0 : i64, scratch_operands = 1 : i64, tpu.core_type = #tpu.core_type<tc>, window_params = [{transform_indices = @transform_0, window_bounds = array<i64: 16, 8>}, {transform_indices = @transform_1, window_bounds = array<i64: 1, 8>}, {transform_indices = @transform_2, window_bounds = array<i64: 1, 128>}]} {
    %c0_i32 = arith.constant 0 : i32
    %0 = arith.cmpi eq, %arg1, %c0_i32 : i32
    %1 = arith.extui %0 : i1 to i32
    %c0_i32_0 = arith.constant 0 : i32
    %2 = arith.cmpi ne, %1, %c0_i32_0 : i32
    scf.if %2 {
      %cst_19 = arith.constant 0.000000e+00 : f32
      %50 = vector.broadcast %cst_19 : f32 to vector<1x8xf32>
      %c0_20 = arith.constant 0 : index
      %c0_21 = arith.constant 0 : index
      %51 = vector.load %arg5[%c0_20, %c0_21] : memref<1x8xf32, #tpu.memory_space<vmem>>, vector<1x8xf32>
      tpu.vector_store %arg5[%c0_20, %c0_21], %50 {strides = array<i32>} : memref<1x8xf32, #tpu.memory_space<vmem>>, vector<1x8xf32>,
    } else {
    }
    %c0 = arith.constant 0 : index
    %c0_1 = arith.constant 0 : index
    %3 = vector.load %arg2[%c0, %c0_1] : memref<16x8xf32, #tpu.memory_space<vmem>>, vector<16x8xf32>
    %c0_2 = arith.constant 0 : index
    %c0_3 = arith.constant 0 : index
    %4 = vector.load %arg3[%c0_2, %c0_3] : memref<1x8xi32, #tpu.memory_space<vmem>>, vector<1x8xi32>
    %cst = arith.constant dense<0xFF800000> : vector<8xf32>
    %5 = vector.multi_reduction <maximumf>, %3, %cst [0] : vector<16x8xf32> to vector<8xf32>
    %6 = vector.shape_cast %5 : vector<8xf32> to vector<1x8xf32>
    %7 = vector.broadcast %6 : vector<1x8xf32> to vector<16x8xf32>
    %8 = arith.subf %3, %7 : vector<16x8xf32>
    %9 = math.exp %8 : vector<16x8xf32>
    %cst_4 = arith.constant dense<0.000000e+00> : vector<8xf32>
    %10 = vector.multi_reduction <add>, %9, %cst_4 [0] : vector<16x8xf32> to vector<8xf32>
    %11 = vector.shape_cast %10 : vector<8xf32> to vector<1x8xf32>
    %12 = tpu.iota {dimensions = array<i32: 0>} : vector<16x1xi32>
    %13 = vector.broadcast %12 : vector<16x1xi32> to vector<16x8xi32>
    %14 = vector.broadcast %4 : vector<1x8xi32> to vector<16x8xi32>
    %15 = arith.cmpi eq, %13, %14 : vector<16x8xi32>
    %cst_5 = arith.constant 0.000000e+00 : f32
    %16 = vector.broadcast %cst_5 : f32 to vector<16x8xf32>
    %17 = arith.select %15, %3, %16 : vector<16x8xi1>, vector<16x8xf32>
    %cst_6 = arith.constant dense<0.000000e+00> : vector<8xf32>
    %18 = vector.multi_reduction <add>, %17, %cst_6 [0] : vector<16x8xf32> to vector<8xf32>
    %19 = vector.shape_cast %18 : vector<8xf32> to vector<1x8xf32>
    %20 = arith.subf %19, %6 : vector<1x8xf32>
    %21 = math.log %11 : vector<1x8xf32>
    %22 = arith.subf %21, %20 : vector<1x8xf32>
    %cst_7 = arith.constant 0.000000e+00 : f32
    %23 = vector.broadcast %cst_7 : f32 to vector<1x8xf32>
    %24 = arith.subf %23, %22 : vector<1x8xf32>
    %25 = math.exp %24 : vector<1x8xf32>
    %cst_8 = arith.constant 1.000000e+00 : f32
    %26 = vector.broadcast %cst_8 : f32 to vector<1x8xf32>
    %27 = arith.subf %26, %25 : vector<1x8xf32>
    %cst_9 = arith.constant 0.000000e+00 : f32
    %28 = vector.broadcast %cst_9 : f32 to vector<1x8xf32>
    %29 = arith.maximumf %27, %28 : vector<1x8xf32>
    %30 = arith.mulf %29, %29 : vector<1x8xf32>
    %cst_10 = arith.constant 1.000000e+00 : f32
    %31 = vector.broadcast %cst_10 : f32 to vector<1x8xf32>
    %32 = arith.mulf %31, %30 : vector<1x8xf32>
    %33 = arith.mulf %32, %22 : vector<1x8xf32>
    %c1_i32 = arith.constant 1 : i32
    %34 = arith.muli %arg0, %c1_i32 : i32
    %35 = arith.addi %34, %arg1 : i32
    %36 = tpu.iota {dimensions = array<i32: 1>} : vector<1x8xi32>
    %c8_i32 = arith.constant 8 : i32
    %37 = arith.muli %35, %c8_i32 : i32
    %38 = vector.broadcast %37 : i32 to vector<1x8xi32>
    %39 = arith.addi %36, %38 : vector<1x8xi32>
    %c8_i32_11 = arith.constant 8 : i32
    %40 = vector.broadcast %c8_i32_11 : i32 to vector<1x8xi32>
    %41 = arith.cmpi slt, %39, %40 : vector<1x8xi32>
    %cst_12 = arith.constant 0.000000e+00 : f32
    %42 = vector.broadcast %cst_12 : f32 to vector<1x8xf32>
    %43 = arith.select %41, %33, %42 : vector<1x8xi1>, vector<1x8xf32>
    %c0_13 = arith.constant 0 : index
    %c0_14 = arith.constant 0 : index
    %44 = vector.load %arg5[%c0_13, %c0_14] : memref<1x8xf32, #tpu.memory_space<vmem>>, vector<1x8xf32>
    %45 = arith.addf %44, %43 : vector<1x8xf32>
    %c0_15 = arith.constant 0 : index
    %c0_16 = arith.constant 0 : index
    %46 = vector.load %arg5[%c0_15, %c0_16] : memref<1x8xf32, #tpu.memory_space<vmem>>, vector<1x8xf32>
    tpu.vector_store %arg5[%c0_15, %c0_16], %45 {strides = array<i32>} : memref<1x8xf32, #tpu.memory_space<vmem>>, vector<1x8xf32>,
    %c0_i32_17 = arith.constant 0 : i32
    %47 = arith.cmpi eq, %arg1, %c0_i32_17 : i32
    %48 = arith.extui %47 : i1 to i32
    %c0_i32_18 = arith.constant 0 : i32
    %49 = arith.cmpi ne, %48, %c0_i32_18 : i32
    scf.if %49 {
      %c0_19 = arith.constant 0 : index
      %c0_20 = arith.constant 0 : index
      %50 = vector.load %arg5[%c0_19, %c0_20] : memref<1x8xf32, #tpu.memory_space<vmem>>, vector<1x8xf32>
      %51 = vector.shape_cast %50 : vector<1x8xf32> to vector<1x1x8xf32>
      %cst_21 = arith.constant dense<0.000000e+00> : vector<1xf32>
      %52 = vector.multi_reduction <add>, %51, %cst_21 [1, 2] : vector<1x1x8xf32> to vector<1xf32>
      %53 = vector.shape_cast %52 : vector<1xf32> to vector<1x1x1xf32>
      %54 = vector.extract %53[0, 0, 0] : f32 from vector<1x1x1xf32>
      %cst_22 = arith.constant 1.250000e-01 : f32
      %55 = arith.mulf %54, %cst_22 : f32
      %cst_23 = arith.constant 0.000000e+00 : f32
      %56 = vector.broadcast %cst_23 : f32 to vector<1x128xf32>
      %57 = vector.broadcast %55 : f32 to vector<1x128xf32>
      %58 = arith.addf %57, %56 : vector<1x128xf32>
      %c0_24 = arith.constant 0 : index
      %c0_25 = arith.constant 0 : index
      %59 = vector.load %arg4[%c0_24, %c0_25] : memref<1x128xf32, #tpu.memory_space<vmem>>, vector<1x128xf32>
      tpu.vector_store %arg4[%c0_24, %c0_25], %58 {strides = array<i32>} : memref<1x128xf32, #tpu.memory_space<vmem>>, vector<1x128xf32>,
    } else {
    }
    return
  }
  func.func @transform_0(%arg0: i32, %arg1: i32) -> (i32, i32) {
    %c1_i32 = arith.constant 1 : i32
    %0 = arith.muli %arg0, %c1_i32 : i32
    %1 = arith.addi %0, %arg1 : i32
    %c0_i32 = arith.constant 0 : i32
    %2 = arith.minsi %1, %c0_i32 : i32
    %c0_i32_0 = arith.constant 0 : i32
    %c0_i32_1 = arith.constant 0 : i32
    return %c0_i32_0, %2 : i32, i32
  }
  func.func @transform_1(%arg0: i32, %arg1: i32) -> (i32, i32) {
    %c1_i32 = arith.constant 1 : i32
    %0 = arith.muli %arg0, %c1_i32 : i32
    %1 = arith.addi %0, %arg1 : i32
    %c0_i32 = arith.constant 0 : i32
    %2 = arith.minsi %1, %c0_i32 : i32
    %c0_i32_0 = arith.constant 0 : i32
    %c0_i32_1 = arith.constant 0 : i32
    return %c0_i32_0, %2 : i32, i32
  }
  func.func @transform_2(%arg0: i32, %arg1: i32) -> (i32, i32) {
    %c0_i32 = arith.constant 0 : i32
    %c0_i32_0 = arith.constant 0 : i32
    return %c0_i32, %arg0 : i32, i32
  }
}

</mosaic_0001>

<bundles_post_ra>
// kernel: tpu_custom_call.1
= control target key start
LH: loop header
LB: loop body
LE: loop exit
PB: predicated region body
PF: predicated region fallthrough
CT: control target
= control target key end

     0   :  { %vm67_vm0 = vcmask 57344   ;;  %v97_v2 = vlaneseq  ;;  %v219_v3 = vmov 0.0   ;;  %vm72_vm1 = vcmask 64512   ;;  %s257_s0 = inlined_call_operand.vmem [shape: f32[16,8], index: 0, kind: input, shape index: {}]   ;;  %s258_s1 = inlined_call_operand.vmem [shape: s32[1,8], index: 1, kind: input, shape index: {}]   ;;  %s259_s2 = inlined_call_operand.hbm [shape: f32[1,128], index: 2, kind: output, shape index: {}]  }
   0x1   :  { %v69_v0 = vld [vmem:[%s257_s0] sm:$0xff]  ;;  %v70_v1 = vld [vmem:[%s257_s0 + $0x8] sm:$0xff]  ;;  %68 = vst.msk [vmem:[#allocation2] sm:$0x1] %vm67_vm0, %v219_v3 }
   0x2   :  { %v73_v4 = vsel %vm72_vm1, %v69_v0, -inf  ;;  %v74_v5 = vsel %vm72_vm1, %v70_v1, -inf }
   0x3   :  { %7 = vsyncpa [#allocation4], 0  ;;  %v75_v6 = vmax.f32 %v73_v4, %v74_v5  ;;  %v98_v7 = vshrl.u32 %v97_v2, 7  ;;  %v184_v11 = vld [vmem:[%s258_s1] ss:$0 sm:$0xff]  ;;  %v127_v50 = vand.u32 127, %v97_v2 }
   0x4   :  { %s220_s0 = smov [#allocation3]   ;;  %s162_s17 = sshll.u32 %s259_s2, 4  ;;  %s163_s17 = int_to_ptr.hbm [resolvable:$true] %s162_s17 }
   0x5   :  { %v76_v8 = vrot.slane %v75_v6, 4  ;;  %v99_v10 = vadd.s32 8, %v98_v7  ;;  %vm101_vm2 = vcmp.eq.s32.totalorder %v98_v7, %v184_v11  ;;  %vm131_vm4 = vcmp.lt.s32.totalorder %v127_v50, 8  ;;  %s160_s1 = sshll.u32 %s220_s0, 4  ;;  %s161_s1 = int_to_ptr.vmem [resolvable:$true] %s160_s1 }
   0x6   :  { %v103_v16 = vsel %vm101_vm2, %v69_v0, 0.0 }
   0x7   :  { %v77_v9 = vmax.f32 %v75_v6, %v76_v8  ;;  %vm102_vm3 = vcmp.eq.s32.totalorder %v99_v10, %v184_v11  ;;  %v105_v20 = vsel %vm72_vm1, %v103_v16, 0.0 }
   0x8   :  { %v104_v17 = vsel %vm102_vm3, %v70_v1, 0.0  ;;  %v133_v54 = vld [vmem:[#allocation2] sm:$0x1] }
   0x9   :  { %v78_v12 = vrot.slane %v77_v9, 2  ;;  %v106_v21 = vsel %vm72_vm1, %v104_v17, 0.0 }
   0xa   :  { %v107_v24 = vadd.f32 %v106_v21, %v105_v20 }
   0xb   :  { %v79_v13 = vmax.f32 %v77_v9, %v78_v12 }
   0xc   :  { %v108_v25 = vrot.slane %v107_v24, 4 }
   0xd   :  { %v80_v14 = vrot.slane %v79_v13, 1 }
   0xe   :  { %v109_v30 = vadd.f32 %v108_v25, %v107_v24 }
   0xf   :  { %v81_v15 = vmax.f32 %v79_v13, %v80_v14 }
  0x10   :  { %v110_v33 = vrot.slane %v109_v30, 2 }
  0x11   :  { %v82_v18 = vsub.f32 %v69_v0, %v81_v15  ;;  %v83_v19 = vsub.f32 %v70_v1, %v81_v15 }
  0x12   :  { %v111_v36 = vadd.f32 %v110_v33, %v109_v30 }
  0x13   :  { %v84_v22 = vmul.f32 1.442695, %v82_v18  ;;  %v86_v23 = vmul.f32 1.442695, %v83_v19 }
  0x14   :  { %v112_v39 = vrot.slane %v111_v36, 1 }
  0x15   :  { %185 = vpow2.f32 %v84_v22 }
  0x16   :  { %187 = vpow2.f32 %v86_v23  ;;  %v113_v41 = vadd.f32 %v112_v39, %v111_v36 }
  0x18   :  { %v114_v42 = vsub.f32 %v113_v41, %v81_v15 }
  0x1b   :  { %v186_v26 = vpop.eup %185 }
  0x1c   :  { %v188_v27 = vpop.eup %187  ;;  %v88_v28 = vsel %vm72_vm1, %v186_v26, 0.0 }
  0x1d   :  { %v89_v29 = vsel %vm72_vm1, %v188_v27, 0.0 }
  0x1e   :  { %v90_v31 = vadd.f32 %v89_v29, %v88_v28 }
  0x20   :  { %v91_v32 = vrot.slane %v90_v31, 4 }
  0x22   :  { %v92_v34 = vadd.f32 %v91_v32, %v90_v31 }
  0x24   :  { %v93_v35 = vrot.slane %v92_v34, 2 }
  0x26   :  { %v94_v37 = vadd.f32 %v93_v35, %v92_v34 }
  0x28   :  { %v95_v38 = vrot.slane %v94_v37, 1 }
  0x2a   :  { %v96_v40 = vadd.f32 %v95_v38, %v94_v37 }
  0x2c   :  { %189 = vlog2.f32 %v96_v40 }
  0x32   :  { %v190_v43 = vpop.eup %189 }
  0x33   :  { %v116_v44 = vmul.f32 0.6931472, %v190_v43 }
  0x35   :  { %v117_v45 = vsub.f32 %v116_v44, %v114_v42 }
  0x37   :  { %v118_v46 = vsub.f32 0.0, %v117_v45 }
  0x39   :  { %v119_v47 = vmul.f32 1.442695, %v118_v46 }
  0x3b   :  { %191 = vpow2.f32 %v119_v47 }
  0x41   :  { %v192_v48 = vpop.eup %191 }
  0x42   :  { %v121_v49 = vsub.f32 1.0, %v192_v48 }
  0x44   :  { %v122_v51 = vmax.f32 %v121_v49, 0.0 }
  0x46   :  { %v123_v52 = vmul.f32 %v122_v51, %v122_v51 }
  0x48   :  { %v124_v53 = vmul.f32 %v123_v52, %v117_v45 }
  0x4a   :  { %v132_v55 = vsel %vm131_vm4, %v124_v53, 0.0 }
  0x4b   :  { %v134_v56 = vadd.f32 %v133_v54, %v132_v55 }
  0x4d   :  { %136 = vst.msk [vmem:[#allocation2] sm:$0x1] %vm67_vm0, %v134_v56 }
  0x54   :  { %v140_v57 = vld [vmem:[#allocation2] sm:$0x1] }
  0x55   :  { %v141_v58 = vsel %vm67_vm0, %v140_v57, 0.0 }
  0x56   :  { %142 = vadd.xlane.f32.xlu0 %v141_v58 }
  0xc9   :  { %v143_v59 = vpop.xlane.xlu0 %142 }
  0xca   :  { %v144_v60 = vrot.slane %v143_v59, 4 }
  0xcc   :  { %v145_v61 = vadd.f32 %v144_v60, %v143_v59 }
  0xce   :  { %v146_v62 = vrot.slane %v145_v61, 2 }
  0xd0   :  { %v147_v63 = vadd.f32 %v146_v62, %v145_v61 }
  0xd2   :  { %v148_v0 = vrot.slane %v147_v63, 1 }
  0xd4   :  { %v149_v1 = vadd.f32 %v148_v0, %v147_v63 }
  0xd6   :  { %180 = vpush %v149_v1 }
 0x107   :  { %s181_s18 = spop %180 }
 0x108   :  { %s151_s19 = smul.f32 0.125, %s181_s18 }
 0x10a   :  { %v152_v2 = vstv %s151_s19 }
 0x10b   :  { %154 = vst [vmem:[#allocation3] sm:$0x1] %v152_v2 }
 0x10c   :  { %165 = dma.vmem_to_hbm [thread:$0]  %s161_s1, 16, %s163_s17, [#allocation4]  }
 0x10d   :  { %217 = dma.done.wait [#allocation4], 16  }
 0x10e   :  { %218 = vsyncadd [#allocation4], 4294967280 }
 0x10f   :  { %170 = vsyncpa [#allocation4], 1 }

</bundles_post_ra>
